<compile_context>
chip_gen: v5e
topology: v5e:2x2
jax: 0.10.0
libtpu: 0.0.40
codegen_flags: <defaults>
</compile_context>

<pallas_src>
import jax
import jax.numpy as jnp
from jax.experimental import pallas as pl
from jax.experimental.pallas import tpu as pltpu


def _round_up(x, m):
    return ((x + m - 1) // m) * m


def _pick_row_tile(m_pad, want=256):
    """Largest multiple-of-8 divisor of m_pad that is <= want.  If that leaves
    a single grid step (no megacore sharding on v7x) and m_pad can be split,
    prefer a divisor giving >= 2 steps."""
    def best(limit):
        t, d = 8, 8
        while d <= min(limit, m_pad):
            if m_pad % d == 0:
                t = d
            d += 8
        return t

    tm = best(want)
    if m_pad // tm == 1 and m_pad >= 16:
        tm = best(m_pad // 2)
    return tm


def _pick_col_tile(dim, want, align=128):
    """Largest tile <= want that is a multiple of `align` and divides `dim`;
    falls back to the full dimension (always a legal block size)."""
    if dim % align != 0:
        return dim
    t = (min(want, dim) // align) * align
    while t >= align:
        if dim % t == 0:
            return t
        t -= align
    return dim


def _mlp_kernel(x_ref, wt_ref, b_ref, o_ref):
    # Full-K contraction per tile: MXU accumulates internally (no f32 scratch
    # round-trip through VMEM, no K grid axis).  Bias add + tanh stay in f32.
    y = jnp.dot(x_ref[...], wt_ref[...], preferred_element_type=jnp.float32)
    y = y + b_ref[...].astype(jnp.float32)
    o_ref[...] = jnp.tanh(y).astype(o_ref.dtype)


def mlp_layer(features, weight, bias, *, tm=256, tn=256,
              compute_dtype=jnp.bfloat16,
              vmem_budget=32 * 1024 * 1024):
    """Pallas equivalent of MLPLayer.forward: tanh(features @ weight.T + bias).

    features: (..., H); weight: (H, H) in nn.Linear (out, in) layout; bias: (H,).
    """
    orig_shape = features.shape
    H = orig_shape[-1]
    assert weight.shape == (H, H) and bias.shape == (H,)

    out_dtype = features.dtype
    x = features.reshape(-1, H)
    M = x.shape[0]

    # Pad rows only to the sublane quantum (8); waste is capped at 7 rows.
    m_pad = _round_up(max(M, 8), 8)
    if m_pad != M:
        x = jnp.pad(x, ((0, m_pad - M), (0, 0)))
    tm = _pick_row_tile(m_pad, want=tm)

    # One-time O(H^2) transpose -> lhs-last x rhs-first contraction (MXU-native,
    # no per-tile XLU transpose), bf16 operands to halve HBM weight traffic.
    if compute_dtype is not None:
        x = x.astype(compute_dtype)
        wt = weight.T.astype(compute_dtype)
    else:
        wt = jnp.transpose(weight)
    b2 = bias.reshape(1, H)

    in_bytes = jnp.dtype(x.dtype).itemsize
    out_bytes = jnp.dtype(out_dtype).itemsize
    # Rough VMEM estimate for the resident-weight path (count W double-buffered
    # to stay conservative); must fit the default scoped limit on every
    # generation, including v7x's 64 MiB physical / 32 MiB default scoped VMEM.
    resident_bytes = (2 * H * H * in_bytes            # resident W^T
                      + 2 * tm * H * in_bytes         # double-buffered x tiles
                      + 2 * tm * H * out_bytes        # double-buffered out tiles
                      + 2 * H * 4)                    # bias

    if resident_bytes <= vmem_budget:
        # Fast path: W^T fully resident (constant index map -> DMA'd once),
        # 1-D grid over row tiles, lane-dense (tm, H) output stores.
        out = pl.pallas_call(
            _mlp_kernel,
            out_shape=jax.ShapeDtypeStruct((m_pad, H), out_dtype),
            grid=(m_pad // tm,),
            in_specs=[
                pl.BlockSpec((tm, H), lambda i: (i, 0)),
                pl.BlockSpec((H, H), lambda i: (0, 0)),   # weight resident in VMEM
                pl.BlockSpec((1, H), lambda i: (0, 0)),
            ],
            out_specs=pl.BlockSpec((tm, H), lambda i: (i, 0)),
            compiler_params=pltpu.CompilerParams(
                dimension_semantics=("parallel",)),
        )(x, wt, b2)
    else:
        # Fallback for large H: tile the output over (M, N), still full-K per
        # tile (no K grid axis, no accumulator scratch); x tile is constant in
        # j so it is not re-fetched across the N axis.
        tn_ = _pick_col_tile(H, tn, 128)
        out = pl.pallas_call(
            _mlp_kernel,
            out_shape=jax.ShapeDtypeStruct((m_pad, H), out_dtype),
            grid=(m_pad // tm, H // tn_),
            in_specs=[
                pl.BlockSpec((tm, H), lambda i, j: (i, 0)),
                pl.BlockSpec((H, tn_), lambda i, j: (0, j)),
                pl.BlockSpec((1, tn_), lambda i, j: (0, j)),
            ],
            out_specs=pl.BlockSpec((tm, tn_), lambda i, j: (i, j)),
            compiler_params=pltpu.CompilerParams(
                dimension_semantics=("parallel", "parallel")),
        )(x, wt, b2)

    if m_pad != M:
        out = out[:M]
    return out.reshape(orig_shape)


def _reference(features, weight, bias):
    return jnp.tanh(features @ weight.T + bias)


if __name__ == "__main__":
    key = jax.random.PRNGKey(0)
    batch, num_sent, hidden = 4, 2, 256
    k1, k2, k3 = jax.random.split(key, 3)

    features = jax.random.normal(k1, (batch, num_sent, hidden), dtype=jnp.float32)
    weight = jax.random.normal(k2, (hidden, hidden), dtype=jnp.float32) * (1.0 / hidden ** 0.5)
    bias = jax.random.normal(k3, (hidden,), dtype=jnp.float32) * 0.1

    ref = _reference(features, weight, bias)

    # Default (production) configuration: resident weight, bf16 matmul operands.
    out = jax.block_until_ready(mlp_layer(features, weight, bias))
    assert out.shape == features.shape
    assert jnp.allclose(out, ref, atol=3e-2, rtol=0.0), float(jnp.max(jnp.abs(out - ref)))

    # f32-compute run (tight numerical check of the kernel structure).
    out_f32 = jax.block_until_ready(mlp_layer(features, weight, bias, compute_dtype=None))
    assert jnp.allclose(out_f32, ref, atol=1e-4, rtol=1e-4), \
        float(jnp.max(jnp.abs(out_f32 - ref)))

    # Force the large-H tiled fallback path (vmem_budget=0) to keep it covered.
    out_tiled = jax.block_until_ready(mlp_layer(features, weight, bias, vmem_budget=0))
    assert jnp.allclose(out_tiled, ref, atol=3e-2, rtol=0.0), \
        float(jnp.max(jnp.abs(out_tiled - ref)))

    print("KERNEL_OK")
</pallas_src>

<mosaic_0001>
module attributes {stable_mosaic.version = 11 : i64} {
  func.func @_mlp_kernel(%arg0: i32, %arg1: memref<8x256xbf16, #tpu.memory_space<vmem>>, %arg2: memref<256x256xbf16, #tpu.memory_space<vmem>>, %arg3: memref<1x256xf32, #tpu.memory_space<vmem>>, %arg4: memref<8x256xf32, #tpu.memory_space<vmem>>) attributes {dimension_semantics = [#tpu.dimension_semantics<parallel>], iteration_bounds = array<i64: 1>, scalar_prefetch = 0 : i64, scratch_operands = 0 : i64, tpu.core_type = #tpu.core_type<tc>, window_params = [{transform_indices = @transform_0, window_bounds = array<i64: 8, 256>}, {pipeline_mode = #tpu.pipeline_mode<synchronous>, transform_indices = @transform_1, window_bounds = array<i64: 256, 256>}, {pipeline_mode = #tpu.pipeline_mode<synchronous>, transform_indices = @transform_2, window_bounds = array<i64: 1, 256>}, {transform_indices = @transform_3, window_bounds = array<i64: 8, 256>}]} {
    %c0 = arith.constant 0 : index
    %c0_0 = arith.constant 0 : index
    %0 = vector.load %arg1[%c0, %c0_0] : memref<8x256xbf16, #tpu.memory_space<vmem>>, vector<8x256xbf16>
    %c0_1 = arith.constant 0 : index
    %c0_2 = arith.constant 0 : index
    %1 = vector.load %arg2[%c0_1, %c0_2] : memref<256x256xbf16, #tpu.memory_space<vmem>>, vector<256x256xbf16>
    %cst = arith.constant dense<0.000000e+00> : vector<8x256xf32>
    %2 = tpu.matmul %0, %1, %cst {dimension_numbers = #tpu.dot_dimension_numbers<[1], [0], [0], [1], [0, 0, 1, 1], [], []>} : vector<8x256xbf16>, vector<256x256xbf16>, vector<8x256xf32> -> vector<8x256xf32>
    %c0_3 = arith.constant 0 : index
    %c0_4 = arith.constant 0 : index
    %3 = vector.load %arg3[%c0_3, %c0_4] : memref<1x256xf32, #tpu.memory_space<vmem>>, vector<1x256xf32>
    %4 = vector.broadcast %3 : vector<1x256xf32> to vector<8x256xf32>
    %5 = arith.addf %2, %4 : vector<8x256xf32>
    %6 = math.tanh %5 : vector<8x256xf32>
    %c0_5 = arith.constant 0 : index
    %c0_6 = arith.constant 0 : index
    %7 = vector.load %arg4[%c0_5, %c0_6] : memref<8x256xf32, #tpu.memory_space<vmem>>, vector<8x256xf32>
    tpu.vector_store %arg4[%c0_5, %c0_6], %6 {strides = array<i32>} : memref<8x256xf32, #tpu.memory_space<vmem>>, vector<8x256xf32>,
    return
  }
  func.func @transform_0(%arg0: i32) -> (i32, i32) {
    %c0_i32 = arith.constant 0 : i32
    %c0_i32_0 = arith.constant 0 : i32
    return %arg0, %c0_i32 : i32, i32
  }
  func.func @transform_1(%arg0: i32) -> (i32, i32) {
    %c0_i32 = arith.constant 0 : i32
    %c0_i32_0 = arith.constant 0 : i32
    %c0_i32_1 = arith.constant 0 : i32
    return %c0_i32, %c0_i32_0 : i32, i32
  }
  func.func @transform_2(%arg0: i32) -> (i32, i32) {
    %c0_i32 = arith.constant 0 : i32
    %c0_i32_0 = arith.constant 0 : i32
    %c0_i32_1 = arith.constant 0 : i32
    return %c0_i32, %c0_i32_0 : i32, i32
  }
  func.func @transform_3(%arg0: i32) -> (i32, i32) {
    %c0_i32 = arith.constant 0 : i32
    %c0_i32_0 = arith.constant 0 : i32
    return %arg0, %c0_i32 : i32, i32
  }
}

</mosaic_0001>

<bundles_post_ra>
// kernel: tpu_custom_call.1
= control target key start
LH: loop header
LB: loop body
LE: loop exit
PB: predicated region body
PF: predicated region fallthrough
CT: control target
= control target key end

     0   :  { %8 = vsyncpa [#allocation3], 0  ;;  %s648_s0 = inlined_call_operand.hbm [shape: bf16[8,256], index: 0, kind: input, shape index: {}]   ;;  %s649_s1 = inlined_call_operand.hbm [shape: bf16[256,256], index: 1, kind: input, shape index: {}]   ;;  %s650_s2 = inlined_call_operand.hbm [shape: f32[1,256], index: 2, kind: input, shape index: {}]   ;;  %s651_s3 = inlined_call_operand.hbm [shape: f32[8,256], index: 3, kind: output, shape index: {}]  }
   0x1   :  { %9 = vsyncpa [#allocation6], 0  ;;  %s26_s14 = sshll.u32 %s649_s1, 4  ;;  %s27_s14 = int_to_ptr.hbm [resolvable:$true] %s26_s14 }
   0x2   :  { %10 = vsyncpa [#allocation4], 0  ;;  %s610_s15 = smov [#allocation5]   ;;  %s16_s19 = sshll.u32 %s648_s0, 4  ;;  %s17_s19 = int_to_ptr.hbm [resolvable:$true] %s16_s19 }
   0x3   :  { %s28_s16 = sshll.u32 %s610_s15, 4  ;;  %s611_s20 = smov 128   ;;  %s29_s16 = int_to_ptr.vmem [resolvable:$true] %s28_s16 }
   0x4   :  { %s612_s21 = smov 8   ;;  %s613_s22 = smov [#allocation2]  }
   0x5   :  { %34 = dma.hbm_to_vmem [thread:$0]  %s27_s14, 4096, %s29_s16, [#allocation6], %s611_s20, %s611_s20, %s612_s21  }
   0x6   :  { %s18_s23 = sshll.u32 %s613_s22, 4  ;;  %s40_s26 = sshll.u32 %s650_s2, 4  ;;  %s19_s23 = int_to_ptr.vmem [resolvable:$true] %s18_s23  ;;  %s41_s26 = int_to_ptr.hbm [resolvable:$true] %s40_s26 }
   0x7   :  { %21 = dma.hbm_to_vmem [thread:$0]  %s17_s19, 128, %s19_s23, [#allocation3]  }
   0x8   :  { %s614_s1 = smov [#allocation7]  }
   0x9   :  { %s42_s27 = sshll.u32 %s614_s1, 4  ;;  %s43_s27 = int_to_ptr.vmem [resolvable:$true] %s42_s27 }
   0xa   :  { %45 = dma.hbm_to_vmem [thread:$0]  %s41_s26, 32, %s43_s27, [#allocation6]  }
   0xb   :  { %604 = dma.done.wait [#allocation3], 128  }
   0xc   :  { %605 = vsyncadd [#allocation3], 4294967168 }
   0xd   :  { %606 = dma.done.wait [#allocation6], 4128  }
   0xe   :  { %607 = vsyncadd [#allocation6], 4294963168  ;;  %v396_v0 = vld [vmem:[#allocation5 + $0x70] sm:$0xf]  ;;  %v481_v1 = vld [vmem:[#allocation5 + $0x74] sm:$0xf0] }
   0xf   :  { %v460_v2 = vld [vmem:[#allocation5 + $0xf0] sm:$0xf]  ;;  %v397_v3 = vor.u32 %v481_v1, %v396_v0  ;;  %v497_v4 = vld [vmem:[#allocation5 + $0xf4] sm:$0xf0]  ;;  %v480_v5 = vld [vmem:[#allocation5 + $0x74] sm:$0xf] }
  0x10   :  { %v398_v6 = vld [vmem:[#allocation5 + $0x78] sm:$0xf0]  ;;  %v461_v7 = vor.u32 %v497_v4, %v460_v2  ;;  %v496_v9 = vld [vmem:[#allocation5 + $0xf4] sm:$0xf]  ;;  %v388_v11 = vld [vmem:[#allocation5 + $0x60] sm:$0xf] }
  0x11   :  { %v401_v8 = vor.u32 %v480_v5, %v398_v6  ;;  %v462_v10 = vld [vmem:[#allocation5 + $0xf8] sm:$0xf0]  ;;  %264 = vmatpush.bf16.msra.mxu0 %v397_v3  ;;  %v479_v13 = vld [vmem:[#allocation5 + $0x64] sm:$0xf0]  ;;  %v452_v14 = vld [vmem:[#allocation5 + $0xe0] sm:$0xf] }
  0x12   :  { %v465_v12 = vor.u32 %v496_v9, %v462_v10  ;;  %v495_v15 = vld [vmem:[#allocation5 + $0xe4] sm:$0xf0]  ;;  %277 = vmatpush.bf16.msra.mxu1 %v461_v7  ;;  %v389_v16 = vor.u32 %v479_v13, %v388_v11  ;;  %v478_v18 = vld [vmem:[#allocation5 + $0x64] sm:$0xf]  ;;  %v390_v19 = vld [vmem:[#allocation5 + $0x68] sm:$0xf0] }
  0x13   :  { %290 = vmatpush.bf16.msra.mxu2 %v401_v8  ;;  %v453_v17 = vor.u32 %v495_v15, %v452_v14  ;;  %v494_v20 = vld [vmem:[#allocation5 + $0xe4] sm:$0xf]  ;;  %v393_v21 = vor.u32 %v478_v18, %v390_v19  ;;  %v454_v22 = vld [vmem:[#allocation5 + $0xe8] sm:$0xf0]  ;;  %v380_v23 = vld [vmem:[#allocation5 + $0x50] sm:$0xf] }
  0x14   :  { %303 = vmatpush.bf16.msra.mxu3 %v465_v12  ;;  %v477_v24 = vld [vmem:[#allocation5 + $0x54] sm:$0xf0]  ;;  %v457_v25 = vor.u32 %v494_v20, %v454_v22  ;;  %v444_v26 = vld [vmem:[#allocation5 + $0xd0] sm:$0xf]  ;;  %v476_v28 = vld [vmem:[#allocation5 + $0x54] sm:$0xf] }
  0x15   :  { %v493_v27 = vld [vmem:[#allocation5 + $0xd4] sm:$0xf0]  ;;  %265 = vmatpush.bf16.msra.mxu0 %v389_v16  ;;  %v381_v29 = vor.u32 %v477_v24, %v380_v23  ;;  %v382_v30 = vld [vmem:[#allocation5 + $0x58] sm:$0xf0]  ;;  %v492_v31 = vld [vmem:[#allocation5 + $0xd4] sm:$0xf] }
  0x16   :  { %v446_v32 = vld [vmem:[#allocation5 + $0xd8] sm:$0xf0]  ;;  %278 = vmatpush.bf16.msra.mxu1 %v453_v17  ;;  %v445_v33 = vor.u32 %v493_v27, %v444_v26  ;;  %v385_v34 = vor.u32 %v476_v28, %v382_v30  ;;  %v372_v35 = vld [vmem:[#allocation5 + $0x40] sm:$0xf]  ;;  %v475_v36 = vld [vmem:[#allocation5 + $0x44] sm:$0xf0] }
  0x17   :  { %291 = vmatpush.bf16.msra.mxu2 %v393_v21  ;;  %v436_v37 = vld [vmem:[#allocation5 + $0xc0] sm:$0xf]  ;;  %v449_v38 = vor.u32 %v492_v31, %v446_v32  ;;  %v491_v39 = vld [vmem:[#allocation5 + $0xc4] sm:$0xf0]  ;;  %v474_v40 = vld [vmem:[#allocation5 + $0x44] sm:$0xf]  ;;  %v373_v44 = vor.u32 %v475_v36, %v372_v35 }
  0x18   :  { %304 = vmatpush.bf16.msra.mxu3 %v457_v25  ;;  %v374_v41 = vld [vmem:[#allocation5 + $0x48] sm:$0xf0]  ;;  %v490_v42 = vld [vmem:[#allocation5 + $0xc4] sm:$0xf]  ;;  %v437_v45 = vor.u32 %v491_v39, %v436_v37  ;;  %v364_v47 = vld [vmem:[#allocation5 + $0x30] sm:$0xf] }
  0x19   :  { %v438_v43 = vld [vmem:[#allocation5 + $0xc8] sm:$0xf0]  ;;  %266 = vmatpush.bf16.msra.mxu0 %v381_v29  ;;  %v377_v46 = vor.u32 %v474_v40, %v374_v41  ;;  %v473_v48 = vld [vmem:[#allocation5 + $0x34] sm:$0xf0]  ;;  %v428_v49 = vld [vmem:[#allocation5 + $0xb0] sm:$0xf] }
  0x1a   :  { %279 = vmatpush.bf16.msra.mxu1 %v445_v33  ;;  %v441_v50 = vor.u32 %v490_v42, %v438_v43  ;;  %v489_v51 = vld [vmem:[#allocation5 + $0xb4] sm:$0xf0]  ;;  %v472_v52 = vld [vmem:[#allocation5 + $0x34] sm:$0xf]  ;;  %v366_v53 = vld [vmem:[#allocation5 + $0x38] sm:$0xf0]  ;;  %v365_v56 = vor.u32 %v473_v48, %v364_v47 }
  0x1b   :  { %292 = vmatpush.bf16.msra.mxu2 %v385_v34  ;;  %v488_v54 = vld [vmem:[#allocation5 + $0xb4] sm:$0xf]  ;;  %v430_v55 = vld [vmem:[#allocation5 + $0xb8] sm:$0xf0]  ;;  %v429_v57 = vor.u32 %v489_v51, %v428_v49  ;;  %v369_v58 = vor.u32 %v472_v52, %v366_v53  ;;  %v356_v59 = vld [vmem:[#allocation5 + $0x20] sm:$0xf] }
  0x1c   :  { %305 = vmatpush.bf16.msra.mxu3 %v449_v38  ;;  %v471_v60 = vld [vmem:[#allocation5 + $0x24] sm:$0xf0]  ;;  %v420_v61 = vld [vmem:[#allocation5 + $0xa0] sm:$0xf]  ;;  %v433_v62 = vor.u32 %v488_v54, %v430_v55  ;;  %v470_v0 = vld [vmem:[#allocation5 + $0x24] sm:$0xf] }
  0x1d   :  { %267 = vmatpush.bf16.msra.mxu0 %v373_v44  ;;  %v487_v63 = vld [vmem:[#allocation5 + $0xa4] sm:$0xf0]  ;;  %v358_v1 = vld [vmem:[#allocation5 + $0x28] sm:$0xf0]  ;;  %v486_v2 = vld [vmem:[#allocation5 + $0xa4] sm:$0xf]  ;;  %v357_v4 = vor.u32 %v471_v60, %v356_v59 }
  0x1e   :  { %280 = vmatpush.bf16.msra.mxu1 %v437_v45  ;;  %v422_v3 = vld [vmem:[#allocation5 + $0xa8] sm:$0xf0]  ;;  %v421_v5 = vor.u32 %v487_v63, %v420_v61  ;;  %v361_v6 = vor.u32 %v470_v0, %v358_v1  ;;  %v348_v7 = vld [vmem:[#allocation5 + $0x10] sm:$0xf]  ;;  %v469_v8 = vld [vmem:[#allocation5 + $0x14] sm:$0xf0] }
  0x1f   :  { %293 = vmatpush.bf16.msra.mxu2 %v377_v46  ;;  %v412_v9 = vld [vmem:[#allocation5 + $0x90] sm:$0xf]  ;;  %v425_v10 = vor.u32 %v486_v2, %v422_v3  ;;  %v485_v11 = vld [vmem:[#allocation5 + $0x94] sm:$0xf0]  ;;  %v468_v12 = vld [vmem:[#allocation5 + $0x14] sm:$0xf]  ;;  %v349_v16 = vor.u32 %v469_v8, %v348_v7 }
  0x20   :  { %306 = vmatpush.bf16.msra.mxu3 %v441_v50  ;;  %v350_v13 = vld [vmem:[#allocation5 + $0x18] sm:$0xf0]  ;;  %v484_v14 = vld [vmem:[#allocation5 + $0x94] sm:$0xf]  ;;  %v413_v18 = vor.u32 %v485_v11, %v412_v9  ;;  %v340_v20 = vld [vmem:[#allocation5] sm:$0xf] }
  0x21   :  { %268 = vmatpush.bf16.msra.mxu0 %v365_v56  ;;  %v414_v15 = vld [vmem:[#allocation5 + $0x98] sm:$0xf0]  ;;  %v353_v19 = vor.u32 %v468_v12, %v350_v13  ;;  %v467_v21 = vld [vmem:[#allocation5 + $0x4] sm:$0xf0]  ;;  %v404_v22 = vld [vmem:[#allocation5 + $0x80] sm:$0xf] }
  0x22   :  { %281 = vmatpush.bf16.msra.mxu1 %v429_v57  ;;  %v58_v17 = vld [vmem:[#allocation2] sm:$0xff]  ;;  %v417_v23 = vor.u32 %v484_v14, %v414_v15  ;;  %v483_v24 = vld [vmem:[#allocation5 + $0x84] sm:$0xf0]  ;;  %v466_v25 = vld [vmem:[#allocation5 + $0x4] sm:$0xf]  ;;  %v341_v30 = vor.u32 %v467_v21, %v340_v20  ;;  %s615_s0 = smov [#allocation8]  }
  0x23   :  { %294 = vmatpush.bf16.msra.mxu2 %v369_v58  ;;  %v342_v26 = vld [vmem:[#allocation5 + $0x8] sm:$0xf0]  ;;  %v482_v27 = vld [vmem:[#allocation5 + $0x84] sm:$0xf]  ;;  %v98_v29 = vunpack.c.l.b16 %v58_v17  ;;  %v99_v31 = vunpack.c.h.b16 %v58_v17  ;;  %v405_v32 = vor.u32 %v483_v24, %v404_v22  ;;  %v91_v37 = vld [vmem:[#allocation7] sm:$0x3] }
  0x24   :  { %307 = vmatpush.bf16.msra.mxu3 %v433_v62  ;;  %v406_v28 = vld [vmem:[#allocation5 + $0x88] sm:$0xf0]  ;;  %v345_v33 = vor.u32 %v466_v25, %v342_v26  ;;  %v93_v38 = vperm.slane %v91_v37, 0  ;;  %v94_v43 = vperm.slane %v91_v37, 1  ;;  %s325_s2 = sshll.u32 %s615_s0, 4  ;;  %s327_s30 = sshll.u32 %s651_s3, 4  ;;  %s326_s2 = int_to_ptr.vmem [resolvable:$true] %s325_s2  ;;  %s328_s30 = int_to_ptr.hbm [resolvable:$true] %s327_s30 }
  0x25   :  { %269 = vmatpush.bf16.msra.mxu0 %v357_v4  ;;  %v409_v34 = vor.u32 %v482_v27, %v406_v28  ;;  %v100_v35 = vpack.c.b16 %v98_v29, %v98_v29  ;;  %v101_v36 = vpack.c.b16 %v99_v31, %v99_v31 }
  0x26   :  { %282 = vmatpush.bf16.msra.mxu1 %v421_v5 }
  0x27   :  { %295 = vmatpush.bf16.msra.mxu2 %v361_v6 }
  0x28   :  { %308 = vmatpush.bf16.msra.mxu3 %v425_v10 }
  0x29   :  { %270 = vmatpush.bf16.msra.mxu0 %v349_v16 }
  0x2a   :  { %283 = vmatpush.bf16.msra.mxu1 %v413_v18 }
  0x2b   :  { %296 = vmatpush.bf16.msra.mxu2 %v353_v19 }
  0x2c   :  { %309 = vmatpush.bf16.msra.mxu3 %v417_v23 }
  0x2d   :  { %271 = vmatpush.bf16.msra.mxu0 %v341_v30 }
  0x2e   :  { %284 = vmatpush.bf16.msra.mxu1 %v405_v32 }
  0x2f   :  { %297 = vmatpush.bf16.msra.mxu2 %v345_v33 }
  0x30   :  { %310 = vmatpush.bf16.msra.mxu3 %v409_v34  ;;  %272 = vmatmul.bf16.vlgmr.msra.gmra.mxu0 %v100_v35 }
  0x31   :  { %285 = vmatmul.bf16.vlgmr.msra.gmra.mxu1 %v101_v36 }
  0x32   :  { %298 = vmatmul.bf16.vlgmr.msra.gmra.mxu2 %v100_v35 }
  0x33   :  { %311 = vmatmul.bf16.vlgmr.msra.gmra.mxu3 %v101_v36 }
  0xad   :  { %v273_v39 = vpop.f32.mrf.mxu0 }
  0xae   :  { %v274_v40 = vadd.f32 %v273_v39, %v93_v38  ;;  %v286_v41 = vpop.f32.mrf.mxu1 }
  0xb0   :  { %v287_v42 = vadd.f32 %v286_v41, %v274_v40 }
  0xb2   :  { %504 = vtanh.f32 %v287_v42 }
  0xb5   :  { %v299_v44 = vpop.f32.mrf.mxu2  ;;  %v275_v47 = vpop.f32.mrf.mxu0 }
  0xb6   :  { %v300_v45 = vadd.f32 %v299_v44, %v94_v43  ;;  %v312_v46 = vpop.f32.mrf.mxu3  ;;  %v288_v48 = vpop.f32.mrf.mxu1 }
  0xb8   :  { %v313_v49 = vadd.f32 %v312_v46, %v300_v45  ;;  %v505_v50 = vpop.eup %504 }
  0xb9   :  { %318 = vst [vmem:[#allocation8] sm:$0xff] %v505_v50 }
  0xba   :  { %506 = vtanh.f32 %v313_v49 }
  0xbd   :  { %v301_v51 = vpop.f32.mrf.mxu2 }
  0xbe   :  { %v314_v52 = vpop.f32.mrf.mxu3 }
  0xc0   :  { %v507_v53 = vpop.eup %506 }
  0xc1   :  { %319 = vst [vmem:[#allocation8 + $0x8] sm:$0xff] %v507_v53 }
  0xc2   :  { %330 = dma.vmem_to_hbm [thread:$0]  %s326_s2, 256, %s328_s30, [#allocation4]  }
  0xc3   :  { %608 = dma.done.wait [#allocation4], 256  }
  0xc4   :  { %609 = vsyncadd [#allocation4], 4294967040 }
  0xc5   :  { %335 = vsyncpa [#allocation3], 1 }
  0xc6   :  { %336 = vsyncpa [#allocation6], 1 }
  0xc7   :  { %337 = vsyncpa [#allocation4], 1 }

</bundles_post_ra>
